<compile_context>
chip_gen: v7x
topology: tpu7x:2x2x1
jax: 0.10.0
libtpu: 0.0.40
codegen_flags: <defaults>
</compile_context>

<pallas_src>
import jax
import jax.numpy as jnp
from jax.experimental import pallas as pl
from jax.experimental.pallas import tpu as pltpu

EPS = 0.01
STEPS = 5  # scalar_integrate default


def _round_up(n, m):
    return ((n + m - 1) // m) * m


def _make_ncds_kernel(d, bt, steps):
    """Kernel with d, batch-tile bt and T (trapezoid nodes) baked in as constants."""
    # trapezoid weights for the integral over [0, 1]:
    #   h * (sum_t y_t - 0.5 * (y_0 + y_{T-1}))
    h = 1.0 / (steps - 1)
    wts = [h] * steps
    wts[0] *= 0.5
    wts[-1] *= 0.5
    t_vals = [k / (steps - 1) for k in range(steps)]  # exact: 0, .25, .5, .75, 1

    def kernel(x_ref, w1_ref, b1_ref, w2_ref, b2_ref, out_ref):
        x = x_ref[...]          # (bt, d)   == c_dot_x (x_0 is zeroed in __init__)
        w1 = w1_ref[...]        # (d, H)
        b1 = b1_ref[...]        # (1, H)
        w2 = w2_ref[...]        # (H, d*d)
        b2 = b2_ref[...]        # (1, d*d)

        # Stack the T trapezoid nodes along the sublane axis:
        #   rows [k*bt, (k+1)*bt) hold c(t_k) = t_k * x   (x_0 == 0)
        c_st = jnp.concatenate([t * x for t in t_vals], axis=0)   # (T*bt, d)
        x_st = jnp.concatenate([x] * steps, axis=0)               # (T*bt, d)

        # J_theta MLP fused over all nodes: single matmul pair + one tanh.
        hid = jnp.tanh(
            jnp.dot(c_st, w1, preferred_element_type=jnp.float32) + b1)   # (T*bt, H)
        jf = jnp.dot(hid, w2, preferred_element_type=jnp.float32) + b2    # (T*bt, d*d)
        # jf[r, i*d + j] == J[r, i, j]

        # y = (-J^T J - eps I) x, row-wise on the VPU/XLU, one pass over the stack:
        #   u_i = sum_j J[r,i,j] * x[r,j]     (lane reduction, keepdims)
        #   w_j += J[r,i,j] * u_i             (broadcast multiply-add)
        w_acc = jnp.zeros_like(x_st)
        for i in range(d):
            row_i = jf[:, i * d:(i + 1) * d]                       # J[:, i, :]
            u_i = jnp.sum(row_i * x_st, axis=1, keepdims=True)     # (T*bt, 1)
            w_acc = w_acc + row_i * u_i
        y = -w_acc - EPS * x_st                                    # (T*bt, d)

        # Trapezoid rule: weighted sum of the T row-groups (static sublane slices).
        out = wts[0] * y[0:bt, :]
        for k in range(1, steps):
            out = out + wts[k] * y[k * bt:(k + 1) * bt, :]
        out_ref[...] = out

    return kernel


def ncds_fast_forward(x, params, *, block_b=128):
    """x: (B, d) float32.  params = (w1 (d,H), b1 (H,), w2 (H,d*d), b2 (d*d,))."""
    w1, b1, w2, b2 = params
    B, d = x.shape
    hidden = w1.shape[1]
    dtype = jnp.float32

    # Batch tile: multiple of 8 sublanes, capped at block_b; pad batch to a
    # whole number of tiles (zero rows, dropped after the call).
    bt = _round_up(min(block_b, _round_up(B, 8)), 8)
    b_pad = _round_up(B, bt)
    x_p = x.astype(dtype)
    if b_pad != B:
        x_p = jnp.zeros((b_pad, d), dtype).at[:B].set(x_p)
    grid = (b_pad // bt,)

    b1_2d = b1.reshape(1, hidden).astype(dtype)
    b2_2d = b2.reshape(1, d * d).astype(dtype)
    operands = (x_p, w1.astype(dtype), b1_2d, w2.astype(dtype), b2_2d)

    # x / out are tiled along the batch grid axis; weights & biases use a
    # constant block index so they are fetched once and stay VMEM-resident.
    in_specs = [
        pl.BlockSpec((bt, d), lambda i: (i, 0)),
        pl.BlockSpec((d, hidden), lambda i: (0, 0)),
        pl.BlockSpec((1, hidden), lambda i: (0, 0)),
        pl.BlockSpec((hidden, d * d), lambda i: (0, 0)),
        pl.BlockSpec((1, d * d), lambda i: (0, 0)),
    ]
    out_spec = pl.BlockSpec((bt, d), lambda i: (i, 0))

    flops = 2 * STEPS * b_pad * (d * hidden + hidden * d * d) + 4 * STEPS * b_pad * d * d
    bytes_accessed = sum(int(a.size) * a.dtype.itemsize for a in operands) + b_pad * d * 4
    cost = pl.CostEstimate(flops=int(flops),
                           transcendentals=int(STEPS * b_pad * hidden),
                           bytes_accessed=int(bytes_accessed))

    out = pl.pallas_call(
        _make_ncds_kernel(d, bt, STEPS),
        grid=grid,
        in_specs=in_specs,
        out_specs=out_spec,
        out_shape=jax.ShapeDtypeStruct((b_pad, d), dtype),
        compiler_params=pltpu.CompilerParams(
            # batch-tile axis is independent work -> "parallel" lets v7x use
            # both TensorCores; harmless on single-TC v5e/v6e.
            dimension_semantics=("parallel",)),
        cost_estimate=cost,
    )(*operands)

    # + x_dot_0, which the module zeroes in __init__  -> no-op
    return out[:B]


def ncds_fast_forward_ref(x, params):
    """Pure-JAX reference mirroring the PyTorch module."""
    w1, b1, w2, b2 = params
    B, d = x.shape
    T = STEPS
    t_vals = jnp.linspace(0.0, 1.0, T)
    c = (t_vals[:, None, None] * x[None, :, :]).reshape(T * B, d)
    xd = jnp.tile(x, (T, 1))
    hid = jnp.tanh(c @ w1 + b1)
    J = (hid @ w2 + b2).reshape(T * B, d, d)
    r = -jnp.einsum('nji,njk->nik', J, J) - EPS * jnp.eye(d)
    y = jnp.einsum('nij,nj->ni', r, xd).reshape(T, B, d)
    h_step = 1.0 / (T - 1)
    return h_step * (y.sum(0) - 0.5 * (y[0] + y[-1]))


if __name__ == "__main__":
    d = 4
    hidden = 16
    B = 2

    key = jax.random.PRNGKey(0)
    k1, k2, k3, k4 = jax.random.split(key, 4)

    # deterministic xavier-uniform init (matches torch init_weights), bias = 0.01
    lim1 = (6.0 / (d + hidden)) ** 0.5
    w1 = jax.random.uniform(k1, (d, hidden), jnp.float32, -lim1, lim1)
    b1 = jnp.full((hidden,), 0.01, jnp.float32)
    lim2 = (6.0 / (hidden + d * d)) ** 0.5
    w2 = jax.random.uniform(k2, (hidden, d * d), jnp.float32, -lim2, lim2)
    b2 = jnp.full((d * d,), 0.01, jnp.float32)
    params = (w1, b1, w2, b2)

    # Small-shape check (B=2, padded to one 8-row tile, grid=(1,)).
    x = jax.random.normal(k3, (B, d), jnp.float32)
    out = ncds_fast_forward(x, params)
    jax.block_until_ready(out)
    ref = ncds_fast_forward_ref(x, params)
    assert out.shape == (B, d)
    assert jnp.allclose(out, ref, atol=1e-5, rtol=1e-5), (out, ref)

    # Multi-tile check: exercises the batch grid axis + padding (grid=(3,)).
    xb = jax.random.normal(k4, (20, d), jnp.float32)
    outb = ncds_fast_forward(xb, params, block_b=8)
    jax.block_until_ready(outb)
    refb = ncds_fast_forward_ref(xb, params)
    assert outb.shape == (20, d)
    assert jnp.allclose(outb, refb, atol=1e-5, rtol=1e-5), (outb, refb)

    print("KERNEL_OK")
</pallas_src>

<mosaic_0001>
module attributes {stable_mosaic.version = 11 : i64} {
  func.func @kernel(%arg0: i32, %arg1: memref<8x4xf32, #tpu.memory_space<vmem>>, %arg2: memref<4x16xf32, #tpu.memory_space<vmem>>, %arg3: memref<1x16xf32, #tpu.memory_space<vmem>>, %arg4: memref<16x16xf32, #tpu.memory_space<vmem>>, %arg5: memref<1x16xf32, #tpu.memory_space<vmem>>, %arg6: memref<8x4xf32, #tpu.memory_space<vmem>>) attributes {dimension_semantics = [#tpu.dimension_semantics<parallel>], iteration_bounds = array<i64: 1>, scalar_prefetch = 0 : i64, scratch_operands = 0 : i64, tpu.core_type = #tpu.core_type<tc>, window_params = [{transform_indices = @transform_0, window_bounds = array<i64: 8, 4>}, {pipeline_mode = #tpu.pipeline_mode<synchronous>, transform_indices = @transform_1, window_bounds = array<i64: 4, 16>}, {pipeline_mode = #tpu.pipeline_mode<synchronous>, transform_indices = @transform_2, window_bounds = array<i64: 1, 16>}, {pipeline_mode = #tpu.pipeline_mode<synchronous>, transform_indices = @transform_3, window_bounds = array<i64: 16, 16>}, {pipeline_mode = #tpu.pipeline_mode<synchronous>, transform_indices = @transform_4, window_bounds = array<i64: 1, 16>}, {transform_indices = @transform_5, window_bounds = array<i64: 8, 4>}]} {
    %c0 = arith.constant 0 : index
    %c0_0 = arith.constant 0 : index
    %0 = vector.load %arg1[%c0, %c0_0] : memref<8x4xf32, #tpu.memory_space<vmem>>, vector<8x4xf32>
    %c0_1 = arith.constant 0 : index
    %c0_2 = arith.constant 0 : index
    %1 = vector.load %arg2[%c0_1, %c0_2] : memref<4x16xf32, #tpu.memory_space<vmem>>, vector<4x16xf32>
    %c0_3 = arith.constant 0 : index
    %c0_4 = arith.constant 0 : index
    %2 = vector.load %arg3[%c0_3, %c0_4] : memref<1x16xf32, #tpu.memory_space<vmem>>, vector<1x16xf32>
    %c0_5 = arith.constant 0 : index
    %c0_6 = arith.constant 0 : index
    %3 = vector.load %arg4[%c0_5, %c0_6] : memref<16x16xf32, #tpu.memory_space<vmem>>, vector<16x16xf32>
    %c0_7 = arith.constant 0 : index
    %c0_8 = arith.constant 0 : index
    %4 = vector.load %arg5[%c0_7, %c0_8] : memref<1x16xf32, #tpu.memory_space<vmem>>, vector<1x16xf32>
    %cst = arith.constant 0.000000e+00 : f32
    %5 = vector.broadcast %cst : f32 to vector<8x4xf32>
    %6 = arith.mulf %5, %0 : vector<8x4xf32>
    %cst_9 = arith.constant 2.500000e-01 : f32
    %7 = vector.broadcast %cst_9 : f32 to vector<8x4xf32>
    %8 = arith.mulf %7, %0 : vector<8x4xf32>
    %cst_10 = arith.constant 5.000000e-01 : f32
    %9 = vector.broadcast %cst_10 : f32 to vector<8x4xf32>
    %10 = arith.mulf %9, %0 : vector<8x4xf32>
    %cst_11 = arith.constant 7.500000e-01 : f32
    %11 = vector.broadcast %cst_11 : f32 to vector<8x4xf32>
    %12 = arith.mulf %11, %0 : vector<8x4xf32>
    %cst_12 = arith.constant 1.000000e+00 : f32
    %13 = vector.broadcast %cst_12 : f32 to vector<8x4xf32>
    %14 = arith.mulf %13, %0 : vector<8x4xf32>
    %15 = tpu.concatenate %6, %8, %10, %12, %14 in 0 : vector<8x4xf32>, vector<8x4xf32>, vector<8x4xf32>, vector<8x4xf32>, vector<8x4xf32> -> vector<40x4xf32>
    %16 = tpu.concatenate %0, %0, %0, %0, %0 in 0 : vector<8x4xf32>, vector<8x4xf32>, vector<8x4xf32>, vector<8x4xf32>, vector<8x4xf32> -> vector<40x4xf32>
    %cst_13 = arith.constant dense<0.000000e+00> : vector<40x16xf32>
    %17 = tpu.matmul %15, %1, %cst_13 {dimension_numbers = #tpu.dot_dimension_numbers<[1], [0], [0], [1], [0, 0, 1, 1], [], []>} : vector<40x4xf32>, vector<4x16xf32>, vector<40x16xf32> -> vector<40x16xf32>
    %18 = vector.broadcast %2 : vector<1x16xf32> to vector<40x16xf32>
    %19 = arith.addf %17, %18 : vector<40x16xf32>
    %20 = math.tanh %19 : vector<40x16xf32>
    %cst_14 = arith.constant dense<0.000000e+00> : vector<40x16xf32>
    %21 = tpu.matmul %20, %3, %cst_14 {dimension_numbers = #tpu.dot_dimension_numbers<[1], [0], [0], [1], [0, 0, 1, 1], [], []>} : vector<40x16xf32>, vector<16x16xf32>, vector<40x16xf32> -> vector<40x16xf32>
    %22 = vector.broadcast %4 : vector<1x16xf32> to vector<40x16xf32>
    %23 = arith.addf %21, %22 : vector<40x16xf32>
    %cst_15 = arith.constant 0.000000e+00 : f32
    %24 = vector.broadcast %cst_15 : f32 to vector<40x4xf32>
    %25 = vector.extract_strided_slice %23 {offsets = [0, 0], sizes = [40, 4], strides = [1, 1]} : vector<40x16xf32> to vector<40x4xf32>
    %26 = arith.mulf %25, %16 : vector<40x4xf32>
    %cst_16 = arith.constant dense<0.000000e+00> : vector<40xf32>
    %27 = vector.multi_reduction <add>, %26, %cst_16 [1] : vector<40x4xf32> to vector<40xf32>
    %28 = vector.shape_cast %27 : vector<40xf32> to vector<40x1xf32>
    %29 = vector.broadcast %28 : vector<40x1xf32> to vector<40x4xf32>
    %30 = arith.mulf %25, %29 : vector<40x4xf32>
    %31 = arith.addf %24, %30 : vector<40x4xf32>
    %32 = vector.extract_strided_slice %23 {offsets = [0, 4], sizes = [40, 4], strides = [1, 1]} : vector<40x16xf32> to vector<40x4xf32>
    %33 = arith.mulf %32, %16 : vector<40x4xf32>
    %cst_17 = arith.constant dense<0.000000e+00> : vector<40xf32>
    %34 = vector.multi_reduction <add>, %33, %cst_17 [1] : vector<40x4xf32> to vector<40xf32>
    %35 = vector.shape_cast %34 : vector<40xf32> to vector<40x1xf32>
    %36 = vector.broadcast %35 : vector<40x1xf32> to vector<40x4xf32>
    %37 = arith.mulf %32, %36 : vector<40x4xf32>
    %38 = arith.addf %31, %37 : vector<40x4xf32>
    %39 = vector.extract_strided_slice %23 {offsets = [0, 8], sizes = [40, 4], strides = [1, 1]} : vector<40x16xf32> to vector<40x4xf32>
    %40 = arith.mulf %39, %16 : vector<40x4xf32>
    %cst_18 = arith.constant dense<0.000000e+00> : vector<40xf32>
    %41 = vector.multi_reduction <add>, %40, %cst_18 [1] : vector<40x4xf32> to vector<40xf32>
    %42 = vector.shape_cast %41 : vector<40xf32> to vector<40x1xf32>
    %43 = vector.broadcast %42 : vector<40x1xf32> to vector<40x4xf32>
    %44 = arith.mulf %39, %43 : vector<40x4xf32>
    %45 = arith.addf %38, %44 : vector<40x4xf32>
    %46 = vector.extract_strided_slice %23 {offsets = [0, 12], sizes = [40, 4], strides = [1, 1]} : vector<40x16xf32> to vector<40x4xf32>
    %47 = arith.mulf %46, %16 : vector<40x4xf32>
    %cst_19 = arith.constant dense<0.000000e+00> : vector<40xf32>
    %48 = vector.multi_reduction <add>, %47, %cst_19 [1] : vector<40x4xf32> to vector<40xf32>
    %49 = vector.shape_cast %48 : vector<40xf32> to vector<40x1xf32>
    %50 = vector.broadcast %49 : vector<40x1xf32> to vector<40x4xf32>
    %51 = arith.mulf %46, %50 : vector<40x4xf32>
    %52 = arith.addf %45, %51 : vector<40x4xf32>
    %cst_20 = arith.constant 0.000000e+00 : f32
    %53 = vector.broadcast %cst_20 : f32 to vector<40x4xf32>
    %54 = arith.subf %53, %52 : vector<40x4xf32>
    %cst_21 = arith.constant 0.00999999977 : f32
    %55 = vector.broadcast %cst_21 : f32 to vector<40x4xf32>
    %56 = arith.mulf %55, %16 : vector<40x4xf32>
    %57 = arith.subf %54, %56 : vector<40x4xf32>
    %58 = vector.extract_strided_slice %57 {offsets = [0, 0], sizes = [8, 4], strides = [1, 1]} : vector<40x4xf32> to vector<8x4xf32>
    %cst_22 = arith.constant 1.250000e-01 : f32
    %59 = vector.broadcast %cst_22 : f32 to vector<8x4xf32>
    %60 = arith.mulf %59, %58 : vector<8x4xf32>
    %61 = vector.extract_strided_slice %57 {offsets = [8, 0], sizes = [8, 4], strides = [1, 1]} : vector<40x4xf32> to vector<8x4xf32>
    %cst_23 = arith.constant 2.500000e-01 : f32
    %62 = vector.broadcast %cst_23 : f32 to vector<8x4xf32>
    %63 = arith.mulf %62, %61 : vector<8x4xf32>
    %64 = arith.addf %60, %63 : vector<8x4xf32>
    %65 = vector.extract_strided_slice %57 {offsets = [16, 0], sizes = [8, 4], strides = [1, 1]} : vector<40x4xf32> to vector<8x4xf32>
    %cst_24 = arith.constant 2.500000e-01 : f32
    %66 = vector.broadcast %cst_24 : f32 to vector<8x4xf32>
    %67 = arith.mulf %66, %65 : vector<8x4xf32>
    %68 = arith.addf %64, %67 : vector<8x4xf32>
    %69 = vector.extract_strided_slice %57 {offsets = [24, 0], sizes = [8, 4], strides = [1, 1]} : vector<40x4xf32> to vector<8x4xf32>
    %cst_25 = arith.constant 2.500000e-01 : f32
    %70 = vector.broadcast %cst_25 : f32 to vector<8x4xf32>
    %71 = arith.mulf %70, %69 : vector<8x4xf32>
    %72 = arith.addf %68, %71 : vector<8x4xf32>
    %73 = vector.extract_strided_slice %57 {offsets = [32, 0], sizes = [8, 4], strides = [1, 1]} : vector<40x4xf32> to vector<8x4xf32>
    %cst_26 = arith.constant 1.250000e-01 : f32
    %74 = vector.broadcast %cst_26 : f32 to vector<8x4xf32>
    %75 = arith.mulf %74, %73 : vector<8x4xf32>
    %76 = arith.addf %72, %75 : vector<8x4xf32>
    %c0_27 = arith.constant 0 : index
    %c0_28 = arith.constant 0 : index
    %77 = vector.load %arg6[%c0_27, %c0_28] : memref<8x4xf32, #tpu.memory_space<vmem>>, vector<8x4xf32>
    tpu.vector_store %arg6[%c0_27, %c0_28], %76 {strides = array<i32>} : memref<8x4xf32, #tpu.memory_space<vmem>>, vector<8x4xf32>,
    return
  }
  func.func @transform_0(%arg0: i32) -> (i32, i32) {
    %c0_i32 = arith.constant 0 : i32
    %c0_i32_0 = arith.constant 0 : i32
    return %arg0, %c0_i32 : i32, i32
  }
  func.func @transform_1(%arg0: i32) -> (i32, i32) {
    %c0_i32 = arith.constant 0 : i32
    %c0_i32_0 = arith.constant 0 : i32
    %c0_i32_1 = arith.constant 0 : i32
    return %c0_i32, %c0_i32_0 : i32, i32
  }
  func.func @transform_2(%arg0: i32) -> (i32, i32) {
    %c0_i32 = arith.constant 0 : i32
    %c0_i32_0 = arith.constant 0 : i32
    %c0_i32_1 = arith.constant 0 : i32
    return %c0_i32, %c0_i32_0 : i32, i32
  }
  func.func @transform_3(%arg0: i32) -> (i32, i32) {
    %c0_i32 = arith.constant 0 : i32
    %c0_i32_0 = arith.constant 0 : i32
    %c0_i32_1 = arith.constant 0 : i32
    return %c0_i32, %c0_i32_0 : i32, i32
  }
  func.func @transform_4(%arg0: i32) -> (i32, i32) {
    %c0_i32 = arith.constant 0 : i32
    %c0_i32_0 = arith.constant 0 : i32
    %c0_i32_1 = arith.constant 0 : i32
    return %c0_i32, %c0_i32_0 : i32, i32
  }
  func.func @transform_5(%arg0: i32) -> (i32, i32) {
    %c0_i32 = arith.constant 0 : i32
    %c0_i32_0 = arith.constant 0 : i32
    return %arg0, %c0_i32 : i32, i32
  }
}

</mosaic_0001>

<bundles_post_ra>
// kernel: tpu_custom_call.1
= control target key start
LH: loop header
LB: loop body
LE: loop exit
PB: predicated region body
PF: predicated region fallthrough
CT: control target
= control target key end

     0   :  { %vm52_vm0 = vcmask 1043456   ;;  %v621_v0 = vmov 0.0   ;;  %vm622_vm1 = vmmov 0   ;;  %vm36_vm2 = vcmask 31744   ;;  %s624_s24 = smov 4   ;;  %s625_s25 = smov 12   ;;  %s829_s1 = inlined_call_operand.vmem [shape: f32[4,16], index: 1, kind: input, shape index: {}]   ;;  %s830_s0 = inlined_call_operand.vmem [shape: f32[8,4], index: 0, kind: input, shape index: {}]   ;;  %s831_s3 = inlined_call_operand.vmem [shape: f32[16,16], index: 3, kind: input, shape index: {}]   ;;  %s832_s2 = inlined_call_operand.vmem [shape: f32[1,16], index: 2, kind: input, shape index: {}]   ;;  %s833_s4 = inlined_call_operand.vmem [shape: f32[1,16], index: 4, kind: input, shape index: {}]   ;;  %s834_s5 = inlined_call_operand.vmem [shape: f32[8,4], index: 5, kind: output, shape index: {}]  }
   0x1   :  { %563 = vmatprep.subr.mxu0 %v621_v0  ;;  %v21_v1 = vld [vmem:[%s829_s1] sm:$0xf]  ;;  %565 = vmatprep.mubr.msk.f32.mxu0 %vm622_vm1, %v621_v0  ;;  %v24_v8 = vld [vmem:[%s831_s3 + $0x8] sm:$0xff]  ;;  %v623_v10 = vmov 0.0|0.0   ;;  %s626_s26 = smov 8   ;;  %vm157_vm3 = vcmask 130048  }
   0x2   :  { %v669_v2 = vld [vmem:[%s830_s0] sm:$0xff]  ;;  %564 = vmatpush3.msk.msra.mxu0 %vm52_vm0, %v21_v1  ;;  %584 = vmatprep.mubr.msk.f32.mxu1 %vm622_vm1, %v621_v0  ;;  %s627_s29 = smov 120   ;;  %s628_s30 = smov 124  }
   0x3   :  { %v26_v3 = vmul.f32 0.0, %v669_v2  ;;  %v27_v4 = vmul.f32 0.25, %v669_v2  ;;  %v28_v5 = vmul.f32 0.5, %v669_v2  ;;  %v29_v6 = vmul.f32 0.75, %v669_v2  ;;  %v23_v7 = vld [vmem:[%s831_s3] sm:$0xff]  ;;  %599 = vmatprep.subr.bf16.mxu1 %v623_v10  ;;  %293 = vrot.lane.b32.xlu0 %v669_v2, %s624_s24 }
   0x4   :  { %v600_v9 = vpack.c.bf16 %v24_v8, %v23_v7  ;;  %439 = vrot.lane.b32.xlu1 %v669_v2, %s625_s25  ;;  %v537_v11 = vld [vmem:[%s832_s2] ss:$0 sm:$0xff] }
   0x5   :  { %566 = vmatmul.mubr.msk.f32.vlgmr.msra.gmra.mrb[0].mxu0 %vm36_vm2, %v26_v3  ;;  %v544_v33 = vld [vmem:[%s833_s4] ss:$0 sm:$0xff]  ;;  %s629_s4 = smov 116  }
   0x6   :  { %568 = vmatprep.mubr.msk.f32.mxu0 %vm622_vm1, %v621_v0  ;;  %601 = vmatpush3.bf16.msra.mxu1 %v600_v9 }
   0x7   :  { %366 = vrot.lane.b32.xlu0 %v669_v2, %s626_s26 }
   0x9   :  { %569 = vmatmul.mubr.msk.f32.gmra.mrb[2].mxu0 %vm36_vm2, %v27_v4 }
   0xa   :  { %571 = vmatprep.mubr.msk.f32.mxu0 %vm622_vm1, %v621_v0 }
   0xd   :  { %572 = vmatmul.mubr.msk.f32.gmra.mrb[4].mxu0 %vm36_vm2, %v28_v5 }
   0xe   :  { %574 = vmatprep.mubr.msk.f32.mxu0 %vm622_vm1, %v621_v0 }
  0x11   :  { %575 = vmatmul.mubr.msk.f32.gmra.mrb[6].mxu0 %vm36_vm2, %v29_v6 }
  0x12   :  { %577 = vmatprep.mubr.msk.f32.mxu0 %vm622_vm1, %v621_v0 }
  0x15   :  { %578 = vmatmul.mubr.msk.f32.gmra.mrb[8].mxu0 %vm36_vm2, %v669_v2 }
  0x75   :  { %v294_v32 = vpop.permute.xlu0 %293 }
  0x76   :  { %v440_v40 = vpop.permute.xlu1 %439 }
  0x79   :  { %v367_v35 = vpop.permute.xlu0 %366 }
  0xd8   :  { %v122_v12 = vpop.f32.mrb[0].mxu0 }
  0xd9   :  { %v123_v13 = vadd.f32 %v537_v11, %v122_v12  ;;  %v567_v14 = vpop.f32.mrb[1].mxu0 }
  0xdb   :  { %611 = vtanh.f32 %v123_v13 }
  0xdc   :  { %v127_v15 = vpop.f32.mrb[2].mxu0 }
  0xdd   :  { %v128_v16 = vadd.f32 %v537_v11, %v127_v15  ;;  %v570_v17 = vpop.f32.mrb[3].mxu0 }
  0xdf   :  { %613 = vtanh.f32 %v128_v16 }
  0xe0   :  { %v132_v18 = vpop.f32.mrb[4].mxu0 }
  0xe1   :  { %v133_v19 = vadd.f32 %v537_v11, %v132_v18  ;;  %v573_v20 = vpop.f32.mrb[5].mxu0 }
  0xe3   :  { %615 = vtanh.f32 %v133_v19 }
  0xe4   :  { %v137_v21 = vpop.f32.mrb[6].mxu0 }
  0xe5   :  { %v612_v22 = vpop.eup %611  ;;  %v138_v23 = vadd.f32 %v537_v11, %v137_v21  ;;  %v576_v24 = vpop.f32.mrb[7].mxu0 }
  0xe6   :  { %585 = vmatmul.mubr.msk.f32.vlgmr.msra.gmra.mrb[0].mxu1 %vm157_vm3, %v612_v22 }
  0xe7   :  { %617 = vtanh.f32 %v138_v23  ;;  %587 = vmatprep.mubr.msk.f32.mxu1 %vm622_vm1, %v621_v0 }
  0xe8   :  { %v142_v25 = vpop.f32.mrb[8].mxu0 }
  0xe9   :  { %v614_v26 = vpop.eup %613  ;;  %v143_v27 = vadd.f32 %v537_v11, %v142_v25  ;;  %v579_v28 = vpop.f32.mrb[9].mxu0 }
  0xea   :  { %588 = vmatmul.mubr.msk.f32.gmra.mrb[2].mxu1 %vm157_vm3, %v614_v26 }
  0xeb   :  { %619 = vtanh.f32 %v143_v27  ;;  %590 = vmatprep.mubr.msk.f32.mxu1 %vm622_vm1, %v621_v0 }
  0xed   :  { %v616_v29 = vpop.eup %615 }
  0xee   :  { %591 = vmatmul.mubr.msk.f32.gmra.mrb[4].mxu1 %vm157_vm3, %v616_v29 }
  0xef   :  { %593 = vmatprep.mubr.msk.f32.mxu1 %vm622_vm1, %v621_v0 }
  0xf1   :  { %v618_v30 = vpop.eup %617 }
  0xf2   :  { %594 = vmatmul.mubr.msk.f32.gmra.mrb[6].mxu1 %vm157_vm3, %v618_v30 }
  0xf3   :  { %596 = vmatprep.mubr.msk.f32.mxu1 %vm622_vm1, %v621_v0 }
  0xf5   :  { %v620_v31 = vpop.eup %619 }
  0xf6   :  { %597 = vmatmul.mubr.msk.f32.gmra.mrb[8].mxu1 %vm157_vm3, %v620_v31 }
 0x1b9   :  { %v239_v34 = vpop.f32.mrb[0].mxu1 }
 0x1ba   :  { %v719_v36 = vadd.f32 %v544_v33, %v239_v34  ;;  %v586_v37 = vpop.f32.mrb[1].mxu1 }
 0x1bc   :  { %v369_v38 = vmul.f32 %v367_v35, %v719_v36  ;;  %v296_v39 = vmul.f32 %v294_v32, %v719_v36  ;;  %v442_v44 = vmul.f32 %v440_v40, %v719_v36  ;;  %v263_v31 = vmul.f32 %v719_v36, %v669_v2 }
 0x1bd   :  { %v244_v41 = vpop.f32.mrb[2].mxu1 }
 0x1be   :  { %v723_v42 = vadd.f32 %v544_v33, %v244_v41  ;;  %379 = vrot.lane.b32.xlu0 %v369_v38, %s627_s29  ;;  %306 = vrot.lane.b32.xlu1 %v296_v39, %s628_s30  ;;  %v589_v43 = vpop.f32.mrb[3].mxu1  ;;  %v268_v34 = vsel %vm36_vm2, %v263_v31, 0.0 }
 0x1c0   :  { %v370_v45 = vmul.f32 %v367_v35, %v723_v42  ;;  %v443_v49 = vmul.f32 %v440_v40, %v723_v42  ;;  %v297_v50 = vmul.f32 %v294_v32, %v723_v42 }
 0x1c1   :  { %v249_v46 = vpop.f32.mrb[4].mxu1 }
 0x1c2   :  { %452 = vrot.lane.b32.xlu0 %v442_v44, %s629_s4  ;;  %381 = vrot.lane.b32.xlu1 %v370_v45, %s627_s29  ;;  %v592_v47 = vpop.f32.mrb[5].mxu1  ;;  %v731_v48 = vadd.f32 %v544_v33, %v249_v46 }
 0x1c4   :  { %v444_v54 = vmul.f32 %v440_v40, %v731_v48  ;;  %v298_v55 = vmul.f32 %v294_v32, %v731_v48  ;;  %v371_v59 = vmul.f32 %v367_v35, %v731_v48  ;;  %v265_v37 = vmul.f32 %v731_v48, %v669_v2 }
 0x1c5   :  { %v254_v51 = vpop.f32.mrb[6].mxu1 }
 0x1c6   :  { %454 = vrot.lane.b32.xlu1 %v443_v49, %s629_s4  ;;  %308 = vrot.lane.b32.xlu0 %v297_v50, %s628_s30  ;;  %v595_v52 = vpop.f32.mrb[7].mxu1  ;;  %v737_v53 = vadd.f32 %v544_v33, %v254_v51  ;;  %v274_v39 = vsel %vm36_vm2, %v265_v37, 0.0 }
 0x1c8   :  { %v299_v60 = vmul.f32 %v294_v32, %v737_v53  ;;  %v372_v61 = vmul.f32 %v367_v35, %v737_v53  ;;  %v445_v0 = vmul.f32 %v440_v40, %v737_v53 }
 0x1c9   :  { %v259_v56 = vpop.f32.mrb[8].mxu1 }
 0x1ca   :  { %456 = vrot.lane.b32.xlu0 %v444_v54, %s629_s4  ;;  %310 = vrot.lane.b32.xlu1 %v298_v55, %s628_s30  ;;  %v598_v57 = vpop.f32.mrb[9].mxu1  ;;  %v743_v58 = vadd.f32 %v544_v33, %v259_v56 }
 0x1cc   :  { %v300_v62 = vmul.f32 %v294_v32, %v743_v58  ;;  %v373_v63 = vmul.f32 %v367_v35, %v743_v58  ;;  %v446_v1 = vmul.f32 %v440_v40, %v743_v58  ;;  %v264_v35 = vmul.f32 %v723_v42, %v669_v2 }
 0x1cd   :  { %v266_v40 = vmul.f32 %v737_v53, %v669_v2  ;;  %v267_v41 = vmul.f32 %v743_v58, %v669_v2 }
 0x1ce   :  { %383 = vrot.lane.b32.xlu1 %v371_v59, %s627_s29  ;;  %312 = vrot.lane.b32.xlu0 %v299_v60, %s628_s30  ;;  %v271_v38 = vsel %vm36_vm2, %v264_v35, 0.0 }
 0x1cf   :  { %v277_v43 = vsel %vm36_vm2, %v266_v40, 0.0  ;;  %v280_v44 = vsel %vm36_vm2, %v267_v41, 0.0 }
 0x1d2   :  { %385 = vrot.lane.b32.xlu1 %v372_v61, %s627_s29  ;;  %314 = vrot.lane.b32.xlu0 %v300_v62, %s628_s30 }
 0x1d6   :  { %387 = vrot.lane.b32.xlu1 %v373_v63, %s627_s29  ;;  %458 = vrot.lane.b32.xlu0 %v445_v0, %s629_s4 }
 0x1da   :  { %460 = vrot.lane.b32.xlu1 %v446_v1, %s629_s4 }
 0x230   :  { %v380_v3 = vpop.permute.xlu0 %379  ;;  %v307_v4 = vpop.permute.xlu1 %306 }
 0x231   :  { %v321_v5 = vsel %vm36_vm2, %v307_v4, 0.0  ;;  %v394_v8 = vsel %vm36_vm2, %v380_v3, 0.0 }
 0x232   :  { %322 = vadd.xlane.f32.xlu0 %v321_v5 }
 0x234   :  { %v453_v6 = vpop.permute.xlu0 %452  ;;  %v382_v7 = vpop.permute.xlu1 %381 }
 0x235   :  { %v467_v12 = vsel %vm36_vm2, %v453_v6, 0.0  ;;  %v397_v15 = vsel %vm36_vm2, %v382_v7, 0.0 }
 0x236   :  { %395 = vadd.xlane.f32.xlu0 %v394_v8 }
 0x238   :  { %v455_v9 = vpop.permute.xlu1 %454  ;;  %v309_v10 = vpop.permute.xlu0 %308 }
 0x239   :  { %v324_v11 = vsel %vm36_vm2, %v309_v10, 0.0  ;;  %v470_v19 = vsel %vm36_vm2, %v455_v9, 0.0 }
 0x23a   :  { %325 = vadd.xlane.f32.xlu1 %v324_v11  ;;  %468 = vadd.xlane.f32.xlu0 %v467_v12 }
 0x23c   :  { %v457_v13 = vpop.permute.xlu0 %456  ;;  %v311_v14 = vpop.permute.xlu1 %310 }
 0x23d   :  { %v327_v16 = vsel %vm36_vm2, %v311_v14, 0.0  ;;  %v473_v20 = vsel %vm36_vm2, %v457_v13, 0.0 }
 0x23e   :  { %398 = vadd.xlane.f32.xlu1 %v397_v15  ;;  %328 = vadd.xlane.f32.xlu0 %v327_v16 }
 0x240   :  { %v384_v17 = vpop.permute.xlu1 %383  ;;  %v313_v18 = vpop.permute.xlu0 %312 }
 0x241   :  { %v400_v23 = vsel %vm36_vm2, %v384_v17, 0.0  ;;  %v330_v24 = vsel %vm36_vm2, %v313_v18, 0.0 }
 0x242   :  { %471 = vadd.xlane.f32.xlu1 %v470_v19  ;;  %474 = vadd.xlane.f32.xlu0 %v473_v20 }
 0x244   :  { %v386_v21 = vpop.permute.xlu1 %385  ;;  %v315_v22 = vpop.permute.xlu0 %314 }
 0x245   :  { %v403_v26 = vsel %vm36_vm2, %v386_v21, 0.0  ;;  %v333_v27 = vsel %vm36_vm2, %v315_v22, 0.0 }
 0x246   :  { %401 = vadd.xlane.f32.xlu1 %v400_v23  ;;  %331 = vadd.xlane.f32.xlu0 %v330_v24 }
 0x248   :  { %v388_v25 = vpop.permute.xlu1 %387  ;;  %v459_v28 = vpop.permute.xlu0 %458 }
 0x249   :  { %v406_v29 = vsel %vm36_vm2, %v388_v25, 0.0  ;;  %v476_v30 = vsel %vm36_vm2, %v459_v28, 0.0 }
 0x24a   :  { %404 = vadd.xlane.f32.xlu1 %v403_v26  ;;  %334 = vadd.xlane.f32.xlu0 %v333_v27 }
 0x24c   :  { %v461_v32 = vpop.permute.xlu1 %460 }
 0x24d   :  { %v479_v33 = vsel %vm36_vm2, %v461_v32, 0.0 }
 0x24e   :  { %407 = vadd.xlane.f32.xlu1 %v406_v29  ;;  %477 = vadd.xlane.f32.xlu0 %v476_v30 }
 0x252   :  { %480 = vadd.xlane.f32.xlu1 %v479_v33  ;;  %269 = vadd.xlane.f32.xlu0 %v268_v34 }
 0x256   :  { %272 = vadd.xlane.f32.xlu1 %v271_v38  ;;  %275 = vadd.xlane.f32.xlu0 %v274_v39 }
 0x25a   :  { %278 = vadd.xlane.f32.xlu1 %v277_v43  ;;  %281 = vadd.xlane.f32.xlu0 %v280_v44 }
 0x2bf   :  { %v323_v45 = vpop.xlane.xlu0 %322 }
 0x2c0   :  { %v336_v46 = vmul.f32 %v323_v45, %v719_v36  ;;  %v517_v45 = vmul.f32 0.01, %v669_v2 }
 0x2c2   :  { %346 = vrot.lane.b32.xlu1 %v336_v46, %s628_s30 }
 0x2c3   :  { %v396_v47 = vpop.xlane.xlu0 %395 }
 0x2c4   :  { %v409_v49 = vmul.f32 %v396_v47, %v719_v36 }
 0x2c6   :  { %419 = vrot.lane.b32.xlu1 %v409_v49, %s627_s29 }
 0x2c7   :  { %v326_v50 = vpop.xlane.xlu1 %325  ;;  %v469_v51 = vpop.xlane.xlu0 %468 }
 0x2c8   :  { %v482_v52 = vmul.f32 %v469_v51, %v719_v36  ;;  %v337_v56 = vmul.f32 %v326_v50, %v723_v42 }
 0x2ca   :  { %492 = vrot.lane.b32.xlu0 %v482_v52, %s629_s4 }
 0x2cb   :  { %v399_v54 = vpop.xlane.xlu1 %398  ;;  %v329_v55 = vpop.xlane.xlu0 %328 }
 0x2cc   :  { %v410_v60 = vmul.f32 %v399_v54, %v723_v42  ;;  %v338_v0 = vmul.f32 %v329_v55, %v731_v48 }
 0x2ce   :  { %348 = vrot.lane.b32.xlu0 %v337_v56, %s628_s30 }
 0x2cf   :  { %v472_v57 = vpop.xlane.xlu1 %471  ;;  %v475_v59 = vpop.xlane.xlu0 %474 }
 0x2d0   :  { %v483_v61 = vmul.f32 %v472_v57, %v723_v42  ;;  %v484_v7 = vmul.f32 %v475_v59, %v731_v48 }
 0x2d2   :  { %494 = vrot.lane.b32.xlu1 %v483_v61, %s629_s4  ;;  %421 = vrot.lane.b32.xlu0 %v410_v60, %s627_s29 }
 0x2d3   :  { %v402_v62 = vpop.xlane.xlu1 %401  ;;  %v332_v63 = vpop.xlane.xlu0 %331 }
 0x2d4   :  { %v411_v3 = vmul.f32 %v402_v62, %v731_v48  ;;  %v339_v9 = vmul.f32 %v332_v63, %v737_v53 }
 0x2d6   :  { %350 = vrot.lane.b32.xlu1 %v338_v0, %s628_s30 }
 0x2d7   :  { %v405_v1 = vpop.xlane.xlu1 %404  ;;  %v335_v5 = vpop.xlane.xlu0 %334 }
 0x2d8   :  { %v412_v4 = vmul.f32 %v405_v1, %v737_v53  ;;  %v340_v8 = vmul.f32 %v335_v5, %v743_v58 }
 0x2da   :  { %423 = vrot.lane.b32.xlu1 %v411_v3, %s627_s29  ;;  %425 = vrot.lane.b32.xlu0 %v412_v4, %s627_s29 }
 0x2db   :  { %v408_v6 = vpop.xlane.xlu1 %407  ;;  %v478_v11 = vpop.xlane.xlu0 %477 }
 0x2dc   :  { %v413_v10 = vmul.f32 %v408_v6, %v743_v58  ;;  %v485_v13 = vmul.f32 %v478_v11, %v737_v53 }
 0x2de   :  { %496 = vrot.lane.b32.xlu1 %v484_v7, %s629_s4  ;;  %354 = vrot.lane.b32.xlu0 %v340_v8, %s628_s30 }
 0x2df   :  { %v481_v12 = vpop.xlane.xlu1 %480  ;;  %v270_v15 = vpop.xlane.xlu0 %269 }
 0x2e0   :  { %v486_v14 = vmul.f32 %v481_v12, %v743_v58  ;;  %v283_v29 = vmul.f32 %v270_v15, %v719_v36 }
 0x2e2   :  { %352 = vrot.lane.b32.xlu1 %v339_v9, %s628_s30  ;;  %427 = vrot.lane.b32.xlu0 %v413_v10, %s627_s29 }
 0x2e3   :  { %v273_v16 = vpop.xlane.xlu1 %272  ;;  %v276_v17 = vpop.xlane.xlu0 %275 }
 0x2e4   :  { %v284_v25 = vmul.f32 %v273_v16, %v723_v42  ;;  %v285_v31 = vmul.f32 %v276_v17, %v731_v48 }
 0x2e6   :  { %498 = vrot.lane.b32.xlu1 %v485_v13, %s629_s4  ;;  %500 = vrot.lane.b32.xlu0 %v486_v14, %s629_s4 }
 0x2e7   :  { %v279_v18 = vpop.xlane.xlu1 %278  ;;  %v282_v19 = vpop.xlane.xlu0 %281 }
 0x2e8   :  { %v286_v46 = vmul.f32 %v279_v18, %v737_v53  ;;  %v287_v36 = vmul.f32 %v282_v19, %v743_v58 }
 0x334   :  { %v347_v20 = vpop.permute.xlu1 %346 }
 0x335   :  { %v361_v32 = vadd.f32 %v347_v20, %v283_v29 }
 0x338   :  { %v420_v22 = vpop.permute.xlu1 %419 }
 0x339   :  { %v434_v35 = vadd.f32 %v420_v22, %v361_v32 }
 0x33c   :  { %v493_v21 = vpop.permute.xlu0 %492 }
 0x33d   :  { %v507_v39 = vadd.f32 %v493_v21, %v434_v35 }
 0x33f   :  { %v512_v47 = vsub.f32 0.0, %v507_v39 }
 0x340   :  { %v349_v23 = vpop.permute.xlu0 %348 }
 0x341   :  { %v362_v27 = vadd.f32 %v349_v23, %v284_v25  ;;  %v518_v55 = vsub.f32 %v512_v47, %v517_v45 }
 0x343   :  { %v523_v0 = vmul.f32 0.125, %v518_v55 }
 0x344   :  { %v495_v24 = vpop.permute.xlu1 %494  ;;  %v422_v26 = vpop.permute.xlu0 %421 }
 0x345   :  { %v435_v30 = vadd.f32 %v422_v26, %v362_v27 }
 0x347   :  { %v508_v37 = vadd.f32 %v495_v24, %v435_v30 }
 0x348   :  { %v351_v28 = vpop.permute.xlu1 %350 }
 0x349   :  { %v363_v38 = vadd.f32 %v351_v28, %v285_v31  ;;  %v513_v44 = vsub.f32 0.0, %v508_v37 }
 0x34b   :  { %v519_v51 = vsub.f32 %v513_v44, %v517_v45 }
 0x34c   :  { %v424_v33 = vpop.permute.xlu1 %423  ;;  %v426_v34 = vpop.permute.xlu0 %425 }
 0x34d   :  { %v436_v40 = vadd.f32 %v424_v33, %v363_v38  ;;  %v524_v62 = vmul.f32 0.25, %v519_v51 }
 0x34f   :  { %v525_v3 = vadd.f32 %v524_v62, %v523_v0 }
 0x350   :  { %v497_v41 = vpop.permute.xlu1 %496  ;;  %v355_v43 = vpop.permute.xlu0 %354 }
 0x351   :  { %v509_v42 = vadd.f32 %v497_v41, %v436_v40  ;;  %v365_v52 = vadd.f32 %v355_v43, %v287_v36 }
 0x353   :  { %v514_v48 = vsub.f32 0.0, %v509_v42 }
 0x354   :  { %v353_v49 = vpop.permute.xlu1 %352  ;;  %v428_v50 = vpop.permute.xlu0 %427 }
 0x355   :  { %v364_v54 = vadd.f32 %v353_v49, %v286_v46  ;;  %v520_v56 = vsub.f32 %v514_v48, %v517_v45  ;;  %v438_v57 = vadd.f32 %v428_v50, %v365_v52 }
 0x357   :  { %v437_v59 = vadd.f32 %v426_v34, %v364_v54  ;;  %v526_v53 = vmul.f32 0.25, %v520_v56 }
 0x358   :  { %v499_v60 = vpop.permute.xlu1 %498  ;;  %v501_v61 = vpop.permute.xlu0 %500 }
 0x359   :  { %v510_v63 = vadd.f32 %v499_v60, %v437_v59  ;;  %v511_v2 = vadd.f32 %v501_v61, %v438_v57  ;;  %v527_v6 = vadd.f32 %v526_v53, %v525_v3 }
 0x35b   :  { %v515_v1 = vsub.f32 0.0, %v510_v63  ;;  %v516_v58 = vsub.f32 0.0, %v511_v2 }
 0x35d   :  { %v521_v4 = vsub.f32 %v515_v1, %v517_v45  ;;  %v522_v5 = vsub.f32 %v516_v58, %v517_v45 }
 0x35f   :  { %v528_v7 = vmul.f32 0.25, %v521_v4  ;;  %v530_v9 = vmul.f32 0.125, %v522_v5 }
 0x361   :  { %v529_v8 = vadd.f32 %v528_v7, %v527_v6 }
 0x363   :  { %v531_v10 = vadd.f32 %v530_v9, %v529_v8 }
 0x365   :  { %532 = vst.msk [vmem:[%s834_s5] sm:$0xff] %vm36_vm2, %v531_v10 }

</bundles_post_ra>
